<compile_context>
chip_gen: v7x
topology: tpu7x:2x2x1
jax: 0.10.0
libtpu: 0.0.40
codegen_flags: <defaults>
</compile_context>

<pallas_src>
import functools
import math

import jax
import jax.numpy as jnp
import numpy as np
from jax import lax
from jax.experimental import pallas as pl
from jax.experimental.pallas import tpu as pltpu

_INV_SQRT_2PI = 1.0 / math.sqrt(2.0 * math.pi)
_LN3 = math.log(3.0)


def _round_up(x, m):
    return ((x + m - 1) // m) * m


def _largest_divisor_leq(n, cap):
    cap = max(1, min(n, cap))
    for d in range(cap, 0, -1):
        if n % d == 0:
            return d
    return 1


def _vmem_capacity_bytes():
    try:
        return int(pltpu.get_tpu_info().vmem_capacity_bytes)
    except Exception:
        return 128 * 1024 * 1024


def _padded_block_bytes(shape, itemsize):
    # VMEM tiles pad the last dim to 128 lanes and the second-to-last to 8 sublanes.
    lead = 1
    for d in shape[:-2]:
        lead *= int(d)
    sub = _round_up(int(shape[-2]), 8)
    lane = _round_up(int(shape[-1]), 128)
    return lead * sub * lane * itemsize


def _mael_attention_kernel(q_ref, k_ref, v_ref, sig_ref,
                           vout_ref, series_ref, prior_ref,
                           *, scale, mask_flag, l_tile):
    q = q_ref[...]        # (BH_T, TL, E)  bf16
    k = k_ref[...]        # (BH_T, E, S)   bf16 (pre-transposed, lane axis = S)
    v = v_ref[...]        # (BH_T, S, D)   bf16
    sig = sig_ref[...]    # (BH_T, TL, 1)  f32

    _, tl, _ = q.shape
    s = k.shape[2]

    # scores = einsum('blhe,bshe->bhls') per (b,h): batched over the head tile,
    # bf16 inputs with f32 accumulation on the MXU.
    scores = jnp.einsum('ble,bes->bls', q, k,
                        preferred_element_type=jnp.float32)   # (BH_T, TL, S)
    attn = scale * scores

    # Row/col indices: causal mask and |i-j| distances generated in-kernel.
    l_off = pl.program_id(1) * l_tile
    row = lax.broadcasted_iota(jnp.int32, (tl, s), 0) + l_off
    col = lax.broadcasted_iota(jnp.int32, (tl, s), 1)
    if mask_flag:                       # TriangularCausalMask: mask j > i
        attn = jnp.where((col > row)[None, :, :], -jnp.inf, attn)

    # softmax over the lane axis.
    # TODO(synk): attention_dropout=0.1 is treated as identity (eval mode).
    m = jnp.max(attn, axis=-1, keepdims=True)
    e = jnp.exp(attn - m)
    series = e * pl.reciprocal(jnp.sum(e, axis=-1, keepdims=True), approx=True)

    # sigma transform: sigmoid(5*sigma) + 1e-5 ; 3**sigma - 1  (exact reciprocal)
    sig_t = jax.nn.sigmoid(sig * 5.0) + 1e-5
    sig_t = jnp.exp(_LN3 * sig_t) - 1.0                 # == 3**sig_t - 1
    inv_sig = pl.reciprocal(sig_t, approx=False)        # (BH_T, TL, 1)

    # Gaussian prior from in-kernel |i-j| distances (f32 compute, bf16 store).
    diff = (row - col).astype(jnp.float32)
    dist2_half = 0.5 * diff * diff                      # (TL, S)
    prior = (_INV_SQRT_2PI * inv_sig) * jnp.exp(
        -dist2_half[None, :, :] * (inv_sig * inv_sig))  # (BH_T, TL, S)

    # V = einsum('bhls,bshd->blhd') per (b,h), bf16-in / f32-acc.
    V = jnp.einsum('bls,bsd->bld', series.astype(jnp.bfloat16), v,
                   preferred_element_type=jnp.float32)  # (BH_T, TL, D)

    vout_ref[...] = V.astype(vout_ref.dtype)
    series_ref[...] = series.astype(series_ref.dtype)
    prior_ref[...] = prior.astype(prior_ref.dtype)


def _mael_attention_v_kernel(q_ref, k_ref, v_ref, vout_ref,
                             *, scale, mask_flag, l_tile):
    # output_attention=False fast path: no series/prior writeback, no prior math,
    # unnormalized probabilities into the MXU, reciprocal row-sum applied to V.
    q = q_ref[...]
    k = k_ref[...]
    v = v_ref[...]
    _, tl, _ = q.shape
    s = k.shape[2]

    scores = jnp.einsum('ble,bes->bls', q, k,
                        preferred_element_type=jnp.float32)
    attn = scale * scores
    if mask_flag:
        l_off = pl.program_id(1) * l_tile
        row = lax.broadcasted_iota(jnp.int32, (tl, s), 0) + l_off
        col = lax.broadcasted_iota(jnp.int32, (tl, s), 1)
        attn = jnp.where((col > row)[None, :, :], -jnp.inf, attn)

    m = jnp.max(attn, axis=-1, keepdims=True)
    e = jnp.exp(attn - m)
    denom = jnp.sum(e, axis=-1, keepdims=True)
    V = jnp.einsum('bls,bsd->bld', e.astype(jnp.bfloat16), v,
                   preferred_element_type=jnp.float32)
    vout_ref[...] = (V * pl.reciprocal(denom, approx=True)).astype(vout_ref.dtype)


def mael_attention(queries, keys, values, sigma, *, mask_flag=True, scale=None,
                   output_attention=True, bh_tile_cap=8, vmem_limit_bytes=None):
    # TODO(synk): external attn_mask / tau / delta arguments are not supported;
    # only the default TriangularCausalMask path of the module is implemented
    # (tau/delta are unused by the module's math anyway).
    B, L, H, E = queries.shape
    _, S, _, D = values.shape
    scale = float(scale) if scale is not None else 1.0 / math.sqrt(E)

    BH = B * H
    # bf16 inputs: half the HBM->VMEM DMA, no per-step VPU re-cast in-kernel.
    q = jnp.transpose(queries, (0, 2, 1, 3)).reshape(BH, L, E).astype(jnp.bfloat16)
    # K pre-transposed to (BH, E, S): lane axis is S and the scores matmul is the
    # natural (M,K)x(K,N) form (no in-kernel XLU transpose).
    k = jnp.transpose(keys, (0, 2, 3, 1)).reshape(BH, E, S).astype(jnp.bfloat16)
    v = jnp.transpose(values, (0, 2, 1, 3)).reshape(BH, S, D).astype(jnp.bfloat16)

    # L tiling. S is never padded: the last block dim is the full array extent,
    # so there is no post-kernel de-pad copy of the attention-sized outputs.
    if L <= 512:
        TL, Lp = L, L
    else:
        TL = 256
        Lp = _round_up(L, TL)
    if Lp != L:
        q = jnp.pad(q, ((0, 0), (0, Lp - L), (0, 0)))

    out_dtype = queries.dtype
    attn_dtype = jnp.bfloat16   # series / prior emitted in bf16

    # Generation-aware VMEM budget (v7x: 64 MiB/TC) with lane-padding-aware
    # per-head estimate and compiler-internal scratch for the f32 intermediates.
    vmem_cap = _vmem_capacity_bytes()
    out_itemsize = jnp.dtype(out_dtype).itemsize
    per_bh = 2 * (  # x2 for double buffering
        _padded_block_bytes((TL, E), 2) +       # q
        _padded_block_bytes((E, S), 2) +        # k
        _padded_block_bytes((S, D), 2) +        # v
        _padded_block_bytes((TL, D), out_itemsize))   # V
    if output_attention:
        per_bh += 2 * (
            _padded_block_bytes((TL, 1), 4) +               # sigma
            2 * _padded_block_bytes((TL, S), 2))            # series + prior
    per_bh += 3 * TL * _round_up(S, 128) * 4                # f32 scores/exp/prior
    budget = vmem_cap // 3
    cap = max(1, min(bh_tile_cap, budget // max(per_bh, 1)))
    # Keep >= 2 grid steps so both v7x TensorCores get work.
    if (Lp // TL) < 2 and BH >= 2:
        cap = min(cap, max(1, BH // 2))
    BH_T = _largest_divisor_leq(BH, cap)

    if vmem_limit_bytes is None:
        vmem_limit_bytes = min(64 * 1024 * 1024, (vmem_cap * 3) // 4)

    grid = (BH // BH_T, Lp // TL)
    cparams = pltpu.CompilerParams(
        dimension_semantics=("parallel", "parallel"),
        vmem_limit_bytes=vmem_limit_bytes)

    q_spec = pl.BlockSpec((BH_T, TL, E), lambda bh, l: (bh, l, 0))
    k_spec = pl.BlockSpec((BH_T, E, S), lambda bh, l: (bh, 0, 0))
    v_spec = pl.BlockSpec((BH_T, S, D), lambda bh, l: (bh, 0, 0))
    vout_spec = pl.BlockSpec((BH_T, TL, D), lambda bh, l: (bh, l, 0))

    if not output_attention:
        kernel = functools.partial(_mael_attention_v_kernel, scale=scale,
                                   mask_flag=mask_flag, l_tile=TL)
        V_flat = pl.pallas_call(
            kernel,
            out_shape=jax.ShapeDtypeStruct((BH, Lp, D), out_dtype),
            grid_spec=pltpu.PrefetchScalarGridSpec(
                num_scalar_prefetch=0, grid=grid,
                in_specs=[q_spec, k_spec, v_spec],
                out_specs=vout_spec),
            compiler_params=cparams,
        )(q, k, v)
        if Lp != L:
            V_flat = V_flat[:, :L, :]
        V = V_flat.reshape(B, H, L, D).transpose(0, 2, 1, 3)
        return V, None

    sig = jnp.transpose(sigma, (0, 2, 1)).reshape(BH, L, 1).astype(jnp.float32)
    if Lp != L:
        sig = jnp.pad(sig, ((0, 0), (0, Lp - L), (0, 0)))

    kernel = functools.partial(_mael_attention_kernel, scale=scale,
                               mask_flag=mask_flag, l_tile=TL)
    out_shapes = (
        jax.ShapeDtypeStruct((BH, Lp, D), out_dtype),     # V
        jax.ShapeDtypeStruct((BH, Lp, S), attn_dtype),    # series (A)
        jax.ShapeDtypeStruct((BH, Lp, S), attn_dtype),    # prior
    )
    in_specs = [q_spec, k_spec, v_spec,
                pl.BlockSpec((BH_T, TL, 1), lambda bh, l: (bh, l, 0))]
    out_specs = [vout_spec,
                 pl.BlockSpec((BH_T, TL, S), lambda bh, l: (bh, l, 0)),
                 pl.BlockSpec((BH_T, TL, S), lambda bh, l: (bh, l, 0))]

    V_flat, series_flat, prior_flat = pl.pallas_call(
        kernel,
        out_shape=out_shapes,
        grid_spec=pltpu.PrefetchScalarGridSpec(
            num_scalar_prefetch=0, grid=grid,
            in_specs=in_specs, out_specs=out_specs),
        compiler_params=cparams,
    )(q, k, v, sig)

    if Lp != L:
        V_flat = V_flat[:, :L, :]
        series_flat = series_flat[:, :L, :]
        prior_flat = prior_flat[:, :L, :]
    V = V_flat.reshape(B, H, L, D).transpose(0, 2, 1, 3)       # (B, L, H, D)
    series = series_flat.reshape(B, H, L, S)
    prior = prior_flat.reshape(B, H, L, S)
    return V, series, prior


def _reference(queries, keys, values, sigma, mask_flag=True, scale=None):
    """Pure-JAX re-statement of the PyTorch forward (bf16 MXU inputs, f32 acc)."""
    B, L, H, E = queries.shape
    _, S, _, D = values.shape
    scale = scale if scale is not None else 1.0 / math.sqrt(E)
    scores = jnp.einsum('blhe,bshe->bhls',
                        queries.astype(jnp.bfloat16), keys.astype(jnp.bfloat16),
                        preferred_element_type=jnp.float32)
    if mask_flag:
        mask = jnp.triu(jnp.ones((L, S), dtype=bool), k=1)
        scores = jnp.where(mask[None, None], -jnp.inf, scores)
    attn = scale * scores
    series = jax.nn.softmax(attn, axis=-1)
    V = jnp.einsum('bhls,bshd->blhd',
                   series.astype(jnp.bfloat16), values.astype(jnp.bfloat16),
                   preferred_element_type=jnp.float32)
    sig = jnp.transpose(sigma, (0, 2, 1))
    sig = jax.nn.sigmoid(sig * 5.0) + 1e-5
    sig = jnp.power(3.0, sig) - 1.0
    sig = jnp.repeat(sig[..., None], S, axis=-1)
    dist = jnp.abs(jnp.arange(L, dtype=jnp.float32)[:, None]
                   - jnp.arange(S, dtype=jnp.float32)[None, :])
    prior = 1.0 / (math.sqrt(2 * math.pi) * sig) * jnp.exp(-dist ** 2 / 2.0 / sig ** 2)
    return V, series, prior


if __name__ == "__main__":
    B, L, H, E = 2, 8, 4, 32
    S, D = L, E

    key = jax.random.PRNGKey(0)
    kq, kk, kv, ks = jax.random.split(key, 4)
    queries = jax.random.normal(kq, (B, L, H, E), dtype=jnp.float32)
    keys_ = jax.random.normal(kk, (B, S, H, E), dtype=jnp.float32)
    values = jax.random.normal(kv, (B, S, H, D), dtype=jnp.float32)
    sigma = jax.random.normal(ks, (B, L, H), dtype=jnp.float32)

    V, series, prior = mael_attention(queries, keys_, values, sigma,
                                      mask_flag=True, output_attention=True)
    V2, _none = mael_attention(queries, keys_, values, sigma,
                               mask_flag=True, output_attention=False)
    jax.block_until_ready((V, series, prior, V2))

    V_ref, series_ref, prior_ref = _reference(queries, keys_, values, sigma,
                                              mask_flag=True)

    np.testing.assert_allclose(np.asarray(V), np.asarray(V_ref),
                               rtol=5e-3, atol=5e-3)
    np.testing.assert_allclose(np.asarray(V2), np.asarray(V_ref),
                               rtol=1e-2, atol=1e-2)
    # series / prior are emitted in bfloat16 -> tolerances sized for bf16 rounding.
    np.testing.assert_allclose(np.asarray(series.astype(jnp.float32)),
                               np.asarray(series_ref), rtol=1e-2, atol=5e-3)
    np.testing.assert_allclose(np.asarray(prior.astype(jnp.float32)),
                               np.asarray(prior_ref), rtol=1e-2, atol=1e-3)

    print("KERNEL_OK")
</pallas_src>

<mosaic_0001>
module attributes {stable_mosaic.version = 11 : i64} {
  func.func @_mael_attention_kernel(%arg0: i32, %arg1: i32, %arg2: memref<4x8x32xbf16, #tpu.memory_space<vmem>>, %arg3: memref<4x32x8xbf16, #tpu.memory_space<vmem>>, %arg4: memref<4x8x32xbf16, #tpu.memory_space<vmem>>, %arg5: memref<4x8x1xf32, #tpu.memory_space<vmem>>, %arg6: memref<4x8x32xf32, #tpu.memory_space<vmem>>, %arg7: memref<4x8x8xbf16, #tpu.memory_space<vmem>>, %arg8: memref<4x8x8xbf16, #tpu.memory_space<vmem>>) attributes {dimension_semantics = [#tpu.dimension_semantics<parallel>, #tpu.dimension_semantics<parallel>], iteration_bounds = array<i64: 2, 1>, scalar_prefetch = 0 : i64, scratch_operands = 0 : i64, tpu.core_type = #tpu.core_type<tc>, window_params = [{transform_indices = @transform_0, window_bounds = array<i64: 4, 8, 32>}, {transform_indices = @transform_1, window_bounds = array<i64: 4, 32, 8>}, {transform_indices = @transform_2, window_bounds = array<i64: 4, 8, 32>}, {transform_indices = @transform_3, window_bounds = array<i64: 4, 8, 1>}, {transform_indices = @transform_4, window_bounds = array<i64: 4, 8, 32>}, {transform_indices = @transform_5, window_bounds = array<i64: 4, 8, 8>}, {transform_indices = @transform_6, window_bounds = array<i64: 4, 8, 8>}]} {
    %c0 = arith.constant 0 : index
    %c0_0 = arith.constant 0 : index
    %c0_1 = arith.constant 0 : index
    %0 = vector.load %arg2[%c0, %c0_0, %c0_1] : memref<4x8x32xbf16, #tpu.memory_space<vmem>>, vector<4x8x32xbf16>
    %c0_2 = arith.constant 0 : index
    %c0_3 = arith.constant 0 : index
    %c0_4 = arith.constant 0 : index
    %1 = vector.load %arg3[%c0_2, %c0_3, %c0_4] : memref<4x32x8xbf16, #tpu.memory_space<vmem>>, vector<4x32x8xbf16>
    %c0_5 = arith.constant 0 : index
    %c0_6 = arith.constant 0 : index
    %c0_7 = arith.constant 0 : index
    %2 = vector.load %arg4[%c0_5, %c0_6, %c0_7] : memref<4x8x32xbf16, #tpu.memory_space<vmem>>, vector<4x8x32xbf16>
    %c0_8 = arith.constant 0 : index
    %c0_9 = arith.constant 0 : index
    %c0_10 = arith.constant 0 : index
    %3 = vector.load %arg5[%c0_8, %c0_9, %c0_10] : memref<4x8x1xf32, #tpu.memory_space<vmem>>, vector<4x8x1xf32>
    "tpu.trace_start"() <{level = 10 : i32, message = "ble,bes->bls"}> : () -> ()
    %cst = arith.constant dense<0.000000e+00> : vector<4x8x8xf32>
    %4 = tpu.matmul %0, %1, %cst {dimension_numbers = #tpu.dot_dimension_numbers<[2], [1], [1], [2], [0, 0, 0, 1, 1, 2], [0], [0]>} : vector<4x8x32xbf16>, vector<4x32x8xbf16>, vector<4x8x8xf32> -> vector<4x8x8xf32>
    "tpu.trace_stop"() : () -> ()
    %cst_11 = arith.constant 0.176776692 : f32
    %5 = vector.broadcast %cst_11 : f32 to vector<4x8x8xf32>
    %6 = arith.mulf %5, %4 : vector<4x8x8xf32>
    %c8_i32 = arith.constant 8 : i32
    %7 = arith.muli %arg1, %c8_i32 : i32
    %8 = tpu.iota {dimensions = array<i32: 0>} : vector<8x8xi32>
    %9 = vector.broadcast %7 : i32 to vector<8x8xi32>
    %10 = arith.addi %8, %9 : vector<8x8xi32>
    %11 = tpu.iota {dimensions = array<i32: 1>} : vector<8x8xi32>
    %12 = arith.cmpi sgt, %11, %10 : vector<8x8xi32>
    %13 = vector.shape_cast %12 : vector<8x8xi1> to vector<1x8x8xi1>
    %cst_12 = arith.constant 0xFF800000 : f32
    %14 = vector.shape_cast %13 : vector<1x8x8xi1> to vector<1x8x8xi1>
    %15 = vector.broadcast %14 : vector<1x8x8xi1> to vector<4x8x8xi1>
    %16 = vector.broadcast %cst_12 : f32 to vector<4x8x8xf32>
    %17 = arith.select %15, %16, %6 : vector<4x8x8xi1>, vector<4x8x8xf32>
    %cst_13 = arith.constant dense<0xFF800000> : vector<4x8xf32>
    %18 = vector.multi_reduction <maximumf>, %17, %cst_13 [2] : vector<4x8x8xf32> to vector<4x8xf32>
    %19 = vector.shape_cast %18 : vector<4x8xf32> to vector<4x8x1xf32>
    %20 = vector.broadcast %19 : vector<4x8x1xf32> to vector<4x8x8xf32>
    %21 = arith.subf %17, %20 : vector<4x8x8xf32>
    %22 = math.exp %21 : vector<4x8x8xf32>
    %cst_14 = arith.constant dense<0.000000e+00> : vector<4x8xf32>
    %23 = vector.multi_reduction <add>, %22, %cst_14 [2] : vector<4x8x8xf32> to vector<4x8xf32>
    %24 = vector.shape_cast %23 : vector<4x8xf32> to vector<4x8x1xf32>
    %25 = tpu.reciprocal %24 {approx = true} : vector<4x8x1xf32> -> vector<4x8x1xf32>
    %26 = vector.broadcast %25 : vector<4x8x1xf32> to vector<4x8x8xf32>
    %27 = arith.mulf %22, %26 : vector<4x8x8xf32>
    %cst_15 = arith.constant 5.000000e+00 : f32
    %28 = vector.broadcast %cst_15 : f32 to vector<4x8x1xf32>
    %29 = arith.mulf %3, %28 : vector<4x8x1xf32>
    %30 = arith.negf %29 : vector<4x8x1xf32>
    %31 = math.exp %30 : vector<4x8x1xf32>
    %cst_16 = arith.constant 1.000000e+00 : f32
    %32 = vector.broadcast %cst_16 : f32 to vector<4x8x1xf32>
    %33 = arith.addf %32, %31 : vector<4x8x1xf32>
    %34 = arith.divf %32, %33 : vector<4x8x1xf32>
    %cst_17 = arith.constant 9.99999974E-6 : f32
    %35 = vector.broadcast %cst_17 : f32 to vector<4x8x1xf32>
    %36 = arith.addf %34, %35 : vector<4x8x1xf32>
    %cst_18 = arith.constant 1.09861231 : f32
    %37 = vector.broadcast %cst_18 : f32 to vector<4x8x1xf32>
    %38 = arith.mulf %37, %36 : vector<4x8x1xf32>
    %39 = math.exp %38 : vector<4x8x1xf32>
    %cst_19 = arith.constant 1.000000e+00 : f32
    %40 = vector.broadcast %cst_19 : f32 to vector<4x8x1xf32>
    %41 = arith.subf %39, %40 : vector<4x8x1xf32>
    %42 = tpu.reciprocal %41 : vector<4x8x1xf32> -> vector<4x8x1xf32>
    %43 = arith.subi %10, %11 : vector<8x8xi32>
    %44 = arith.sitofp %43 : vector<8x8xi32> to vector<8x8xf32>
    %cst_20 = arith.constant 5.000000e-01 : f32
    %45 = vector.broadcast %cst_20 : f32 to vector<8x8xf32>
    %46 = arith.mulf %45, %44 : vector<8x8xf32>
    %47 = arith.mulf %46, %44 : vector<8x8xf32>
    %cst_21 = arith.constant 0.398942292 : f32
    %48 = vector.broadcast %cst_21 : f32 to vector<4x8x1xf32>
    %49 = arith.mulf %48, %42 : vector<4x8x1xf32>
    %50 = vector.shape_cast %47 : vector<8x8xf32> to vector<1x8x8xf32>
    %cst_22 = arith.constant 0.000000e+00 : f32
    %51 = vector.broadcast %cst_22 : f32 to vector<1x8x8xf32>
    %52 = arith.subf %51, %50 : vector<1x8x8xf32>
    %53 = arith.mulf %42, %42 : vector<4x8x1xf32>
    %54 = vector.broadcast %52 : vector<1x8x8xf32> to vector<4x8x8xf32>
    %55 = vector.broadcast %53 : vector<4x8x1xf32> to vector<4x8x8xf32>
    %56 = arith.mulf %54, %55 : vector<4x8x8xf32>
    %57 = math.exp %56 : vector<4x8x8xf32>
    %58 = vector.broadcast %49 : vector<4x8x1xf32> to vector<4x8x8xf32>
    %59 = arith.mulf %58, %57 : vector<4x8x8xf32>
    %60 = arith.truncf %27 : vector<4x8x8xf32> to vector<4x8x8xbf16>
    "tpu.trace_start"() <{level = 10 : i32, message = "bls,bsd->bld"}> : () -> ()
    %cst_23 = arith.constant dense<0.000000e+00> : vector<4x8x32xf32>
    %61 = tpu.matmul %60, %2, %cst_23 {dimension_numbers = #tpu.dot_dimension_numbers<[2], [1], [1], [2], [0, 0, 0, 1, 1, 2], [0], [0]>} : vector<4x8x8xbf16>, vector<4x8x32xbf16>, vector<4x8x32xf32> -> vector<4x8x32xf32>
    "tpu.trace_stop"() : () -> ()
    %c0_24 = arith.constant 0 : index
    %c0_25 = arith.constant 0 : index
    %c0_26 = arith.constant 0 : index
    %62 = vector.load %arg6[%c0_24, %c0_25, %c0_26] : memref<4x8x32xf32, #tpu.memory_space<vmem>>, vector<4x8x32xf32>
    tpu.vector_store %arg6[%c0_24, %c0_25, %c0_26], %61 {strides = array<i32>} : memref<4x8x32xf32, #tpu.memory_space<vmem>>, vector<4x8x32xf32>,
    %63 = arith.truncf %27 : vector<4x8x8xf32> to vector<4x8x8xbf16>
    %c0_27 = arith.constant 0 : index
    %c0_28 = arith.constant 0 : index
    %c0_29 = arith.constant 0 : index
    %64 = vector.load %arg7[%c0_27, %c0_28, %c0_29] : memref<4x8x8xbf16, #tpu.memory_space<vmem>>, vector<4x8x8xbf16>
    tpu.vector_store %arg7[%c0_27, %c0_28, %c0_29], %63 {strides = array<i32>} : memref<4x8x8xbf16, #tpu.memory_space<vmem>>, vector<4x8x8xbf16>,
    %65 = arith.truncf %59 : vector<4x8x8xf32> to vector<4x8x8xbf16>
    %c0_30 = arith.constant 0 : index
    %c0_31 = arith.constant 0 : index
    %c0_32 = arith.constant 0 : index
    %66 = vector.load %arg8[%c0_30, %c0_31, %c0_32] : memref<4x8x8xbf16, #tpu.memory_space<vmem>>, vector<4x8x8xbf16>
    tpu.vector_store %arg8[%c0_30, %c0_31, %c0_32], %65 {strides = array<i32>} : memref<4x8x8xbf16, #tpu.memory_space<vmem>>, vector<4x8x8xbf16>,
    return
  }
  func.func @transform_0(%arg0: i32, %arg1: i32) -> (i32, i32, i32) {
    %c0_i32 = arith.constant 0 : i32
    %c0_i32_0 = arith.constant 0 : i32
    return %arg0, %arg1, %c0_i32 : i32, i32, i32
  }
  func.func @transform_1(%arg0: i32, %arg1: i32) -> (i32, i32, i32) {
    %c0_i32 = arith.constant 0 : i32
    %c0_i32_0 = arith.constant 0 : i32
    %c0_i32_1 = arith.constant 0 : i32
    return %arg0, %c0_i32, %c0_i32_0 : i32, i32, i32
  }
  func.func @transform_2(%arg0: i32, %arg1: i32) -> (i32, i32, i32) {
    %c0_i32 = arith.constant 0 : i32
    %c0_i32_0 = arith.constant 0 : i32
    %c0_i32_1 = arith.constant 0 : i32
    return %arg0, %c0_i32, %c0_i32_0 : i32, i32, i32
  }
  func.func @transform_3(%arg0: i32, %arg1: i32) -> (i32, i32, i32) {
    %c0_i32 = arith.constant 0 : i32
    %c0_i32_0 = arith.constant 0 : i32
    return %arg0, %arg1, %c0_i32 : i32, i32, i32
  }
  func.func @transform_4(%arg0: i32, %arg1: i32) -> (i32, i32, i32) {
    %c0_i32 = arith.constant 0 : i32
    %c0_i32_0 = arith.constant 0 : i32
    return %arg0, %arg1, %c0_i32 : i32, i32, i32
  }
  func.func @transform_5(%arg0: i32, %arg1: i32) -> (i32, i32, i32) {
    %c0_i32 = arith.constant 0 : i32
    %c0_i32_0 = arith.constant 0 : i32
    return %arg0, %arg1, %c0_i32 : i32, i32, i32
  }
  func.func @transform_6(%arg0: i32, %arg1: i32) -> (i32, i32, i32) {
    %c0_i32 = arith.constant 0 : i32
    %c0_i32_0 = arith.constant 0 : i32
    return %arg0, %arg1, %c0_i32 : i32, i32, i32
  }
}

</mosaic_0001>

<bundles_post_ra>
// kernel: tpu_custom_call.1
= control target key start
LH: loop header
LB: loop body
LE: loop exit
PB: predicated region body
PF: predicated region fallthrough
CT: control target
= control target key end

     0   :  { %s2530_s0 = inlined_call_operand.hbm [shape: bf16[8,8,32], index: 0, kind: input, shape index: {}]   ;;  %s2531_s1 = inlined_call_operand.hbm [shape: bf16[8,32,8], index: 1, kind: input, shape index: {}]   ;;  %s2532_s2 = inlined_call_operand.hbm [shape: bf16[8,8,32], index: 2, kind: input, shape index: {}]   ;;  %s2533_s3 = inlined_call_operand.hbm [shape: f32[8,8,1], index: 3, kind: input, shape index: {}]   ;;  %s2534_s4 = inlined_call_operand.hbm [shape: f32[8,8,32], index: 4, kind: output, shape index: {0}]   ;;  %s2535_s5 = inlined_call_operand.hbm [shape: bf16[8,8,8], index: 5, kind: output, shape index: {1}]   ;;  %s2536_s6 = inlined_call_operand.hbm [shape: bf16[8,8,8], index: 6, kind: output, shape index: {2}]  }
   0x1   :  { %2552 = sst [smem:[#allocation25_spill]] %s2530_s0 }
   0x2   :  { %2553 = sst [smem:[#allocation26_spill]] %s2531_s1 }
   0x3   :  { %2554 = sst [smem:[#allocation27_spill]] %s2534_s4 }
   0x4   :  { %12 = vsyncpa [#allocation3], 0 }
   0x5   :  { %14 = vsyncpa [#allocation3 + $0x1], 0 }
   0x6   :  { %15 = vsyncpa [#allocation6], 0 }
   0x7   :  { %17 = vsyncpa [#allocation6 + $0x1], 0 }
   0x8   :  { %18 = vsyncpa [#allocation9], 0 }
   0x9   :  { %20 = vsyncpa [#allocation9 + $0x1], 0 }
   0xa   :  { %21 = vsyncpa [#allocation4], 0 }
   0xb   :  { %23 = vsyncpa [#allocation4 + $0x1], 0 }
   0xc   :  { %24 = vsyncpa [#allocation12], 0 }
   0xd   :  { %26 = vsyncpa [#allocation12 + $0x1], 0  ;;  %s1987_s21 = smov 0   ;;  %s1989_s22 = smov 0  }
   0xe   :  { %s1991_s23 = smov 0   ;;  %s1993_s24 = smov 0  }
   0xf   :  { %s1995_s25 = smov 0   ;;  %s1997_s26 = smov 0  }
  0x10 LB: > { %2555 = sst [smem:[#allocation19_spill]] %s1912_s21  ;;  %s2018_s27 = sadd.s32 4294967295, %s1932_s26   ;;  %s1932_s26 = sphi %s1997_s26, %s32_s26   ;;  %s1928_s25 = sphi %s1995_s25, %s2589_s25   ;;  %s1924_s24 = sphi %s1993_s24, %s2588_s24   ;;  %s1920_s23 = sphi %s1991_s23, %s2584_s23   ;;  %s1916_s22 = sphi %s1989_s22, %s2587_s22   ;;  %s1912_s21 = sphi %s1987_s21, %s2586_s21  }
  0x11   : > { %2556 = sst [smem:[#allocation20_spill]] %s1920_s23  ;;  %s2537_s28 = sadd.s32 4294967294, %s1932_s26  }
  0x12   : > { %2557 = sst [smem:[#allocation21_spill]] %s1932_s26  ;;  %s44_s29 = sadd.s32 1, %s1928_s25 }
  0x13   : > { %s53_s30 = sadd.s32 1, %s1920_s23  ;;  %p46_p0 = scmp.ge.s32.totalorder %s44_s29, 2 }
  0x14   : > { %p60_p1 = scmp.ne.s32.totalorder %s1920_s23, %s1916_s22  ;;  %p61_p2 = scmp.eq.s32.totalorder %s1932_s26, 0 }
  0x15   : > { %p66_p3 = scmp.ne.s32.totalorder %s1916_s22, %s1912_s21  ;;  %s2591_s29 = smov (%p46_p0, %s44_s29), 0 }
  0x16   : > { %2558 = sst [smem:[#allocation22_spill]] %s2591_s29  ;;  %p2030_p4 = por %p61_p2, %p60_p1 }
  0x17   : > { %p67_p5 = scmp.eq.s32.totalorder %s2018_s27, 0  ;;  %s48_s8 = ssub.s32 %s1928_s25, %s2591_s29 }
  0x18   : > { %p172_p6 = scmp.eq.s32.totalorder %s2018_s27, 1  ;;  %p51_p7 = scmp.eq.s32.totalorder %s48_s8, 0 }
  0x19   : > { %p2038_p8 = por %p67_p5, %p66_p3  ;;  %p178_p10 = scmp.eq.s32.totalorder %s2537_s28, 1 }
  0x1a   : > { %p2042_p9 = por %p172_p6, %p60_p1  ;;  %p1535_p13 = scmp.lt.s32.totalorder %s1932_s26, 2 }
  0x1b   : > { %s2560_s9 = scalar_select %p2038_p8, 1, 0 }
  0x1c   : > { %s2561_s10 = scalar_select %p2042_p9, 1, 0 }
  0x1d   : > { %s2049_s11 = scalar_select %p51_p7, %s1920_s23, %s53_s30  }
  0x1e   : > { %p2051_p11 = por %p178_p10, %p66_p3  ;;  %s2058_s13 = sand.u32 1, %s1920_s23  }
  0x1f   : > { %2562 = sst [smem:[#allocation23_spill]] %s2049_s11  ;;  %p2062_p0 = pnand %p1535_p13, %p2030_p4 }
  0x20   : > { %s2563_s12 = scalar_select %p2051_p11, 1, 0 }
  0x21   : > { %s276_s15 = sand.u32 1, %s1932_s26   ;;  %s1361_s16 = sshll.u32 %s2058_s13, 6 }
  0x22   : > { %2564 = sst [smem:[#allocation24_spill]] %s2563_s12  ;;  %s1416_s17 = sshll.u32 %s1928_s25, 10 }
  0x23   : > { %s280_s18 = scalar_lea.vmem [#allocation5], %s1361_s16  ;;  %s2566_s1 = sld [smem:[#allocation26_spill]] }
  0x24   : > { %s288_s19 = sshll.u32 %s280_s18, 4  ;;  %s2076_s7 = scalar_lea.sflag [#allocation6], %s276_s15  ;;  %s2074_s19 = int_to_ptr.vmem [resolvable:$true] %s288_s19 }
  0x25   : > { %p2082_p2 = pneg %p2062_p0 }
  0x29   : > { %s2072_s8 = scalar_lea.hbm %s2566_s1, %s1416_s17  ;;  %s1667_s18 = scalar_lea.hbm %s2566_s1, 2048 }
  0x2a   : > { %s1662_s28 = scalar_lea.hbm %s2072_s8, 1024  ;;  %p1668_p5 = scmp.lt.u32.totalorder %s2072_s8, %s2566_s1 }
  0x2b   : > { %p1663_p1 = scmp.ne.s32.totalorder %s2072_s8, %s1662_s28  ;;  %p1669_p6 = scmp.lt.u32.totalorder %s1667_s18, %s1662_s28 }
  0x2c   : > { %p1671_p10 = scmp.lt.u32.totalorder %s1662_s28, %s2072_s8 }
  0x2d   : > { %p1665_p3 = pnand %p2082_p2, %p1663_p1  ;;  %p1670_p7 = por %p1669_p6, %p1668_p5 }
  0x2f   : > { %p1666_p4 = pneg %p1665_p3  ;;  %p1672_p13 = por %p1671_p10, %p1670_p7 }
  0x31   : > { %p1673_p12 = pnand %p1672_p13, %p1666_p4 }
  0x33   : > { %1676 = shalt.err (!%p1673_p12)
}
  0x34   : > { %s1677_s15 = scalar_lea.vmem %s2074_s19, 1024  ;;  %s1934_s16 = smov [#allocation5]  }
  0x35   : > { %p1678_p1 = scmp.ne.s32.totalorder %s2074_s19, %s1677_s15  ;;  %s1682_s17 = sshll.u32 %s1934_s16, 4  ;;  %s1683_s17 = int_to_ptr.vmem [resolvable:$false] %s1682_s17 }
  0x36   : > { %s1684_s20 = scalar_lea.vmem %s1683_s17, 2048  ;;  %p1685_p9 = scmp.lt.s32.totalorder %s2074_s19, %s1683_s17 }
  0x37   : > { %p1680_p3 = pnand %p1678_p1, %p2082_p2  ;;  %p1686_p8 = scmp.lt.s32.totalorder %s1684_s20, %s1677_s15 }
  0x39   : > { %p1681_p11 = pneg %p1680_p3  ;;  %p1687_p5 = por %p1686_p8, %p1685_p9 }
  0x3b   : > { %p1688_p6 = pnand %p1687_p5, %p1681_p11 }
  0x3d   : > { %1691 = shalt.err (!%p1688_p6)
}
  0x3e   : > { %s2541_s28 = smov 64   ;;  %s2543_s18 = smov 4  }
  0x3f   : > { %1518 = dma.hbm_to_vmem [thread:$0]  (!%p2062_p0), %s2072_s8, 1024, %s2074_s19, %s2076_s7, %s2541_s28, %s2541_s28, %s2543_s18  }
  0x40   : > { %p1371_p8 = scmp.ge.s32.totalorder %s1932_s26, 1  ;;  %p339_p9 = scmp.lt.s32.totalorder %s1932_s26, 3 }
  0x41   : > { %s2550_s15 = sshll.u32 %s2058_s13, 4  ;;  %s1414_s16 = sshll.u32 %s1928_s25, 8 }
  0x42   : > { %p2111_p11 = pnand %p1371_p8, %p339_p9  ;;  %s2569_s0 = sld [smem:[#allocation25_spill]] }
  0x43   : > { %s258_s11 = scalar_lea.vmem [#allocation2], %s2550_s15  ;;  %s2129_s18 = scalar_lea.hbm %s2532_s2, %s1414_s16 }
  0x44   : > { %s2568_s30 = scalar_select %p2111_p11, 1, 0 }
  0x45   : > { %s266_s19 = sshll.u32 %s258_s11, 4  ;;  %s255_s23 = scalar_lea.sflag [#allocation3], %s2058_s13  ;;  %s2124_s19 = int_to_ptr.vmem [resolvable:$true] %s266_s19 }
  0x48   : > { %s2120_s1 = scalar_lea.hbm %s2569_s0, %s1414_s16  ;;  %s1697_s12 = scalar_lea.hbm %s2569_s0, 512 }
  0x49   : > { %s1692_s26 = scalar_lea.hbm %s2120_s1, 256  ;;  %p1698_p10 = scmp.lt.u32.totalorder %s2120_s1, %s2569_s0 }
  0x4a   : > { %p1693_p12 = scmp.ne.s32.totalorder %s2120_s1, %s1692_s26  ;;  %p1699_p13 = scmp.lt.u32.totalorder %s1697_s12, %s1692_s26 }
  0x4b   : > { %p1701_p3 = scmp.lt.u32.totalorder %s1692_s26, %s2120_s1 }
  0x4c   : > { %p1695_p4 = pnand %p1693_p12, %p2082_p2  ;;  %p1700_p1 = por %p1699_p13, %p1698_p10 }
  0x4e   : > { %p1696_p7 = pneg %p1695_p4  ;;  %p1702_p5 = por %p1701_p3, %p1700_p1 }
  0x50   : > { %p1703_p6 = pnand %p1702_p5, %p1696_p7 }
  0x52   : > { %1706 = shalt.err (!%p1703_p6)
}
  0x53   : > { %s1707_s11 = scalar_lea.vmem %s2124_s19, 256  ;;  %s1937_s28 = smov [#allocation2]  }
  0x54   : > { %p1708_p8 = scmp.ne.s32.totalorder %s2124_s19, %s1707_s11  ;;  %s1712_s16 = sshll.u32 %s1937_s28, 4  ;;  %s1713_s16 = int_to_ptr.vmem [resolvable:$false] %s1712_s16 }
  0x55   : > { %s1714_s21 = scalar_lea.vmem %s1713_s16, 512  ;;  %p1715_p4 = scmp.lt.s32.totalorder %s2124_s19, %s1713_s16 }
  0x56   : > { %p1710_p9 = pnand %p1708_p8, %p2082_p2  ;;  %p1716_p11 = scmp.lt.s32.totalorder %s1714_s21, %s1707_s11 }
  0x58   : > { %p1711_p12 = pneg %p1710_p9  ;;  %p1717_p10 = por %p1716_p11, %p1715_p4 }
  0x5a   : > { %p1718_p13 = pnand %p1717_p10, %p1711_p12 }
  0x5c   : > { %1721 = shalt.err (!%p1718_p13)
}
  0x5d   : > { %s2570_s26 = smov 4   ;;  %s2571_s12 = smov 64  }
  0x5e   : > { %1515 = dma.hbm_to_vmem [thread:$0]  (!%p2062_p0), %s2120_s1, 256, %s2124_s19, %s255_s23, %s2571_s12, %s2571_s12, %s2570_s26  }
  0x5f   : > { %s2572_s15 = sshll.u32 %s2058_s13, 4  ;;  %s1368_s20 = sshll.u32 %s2058_s13, 5 }
  0x60   : > { %s302_s8 = scalar_lea.vmem [#allocation7], %s2572_s15  ;;  %s1722_s11 = scalar_lea.hbm %s2129_s18, 256 }
  0x61   : > { %s309_s17 = sshll.u32 %s302_s8, 4  ;;  %p1723_p11 = scmp.ne.s32.totalorder %s2129_s18, %s1722_s11  ;;  %s2160_s17 = int_to_ptr.vmem [resolvable:$true] %s309_s17 }
  0x62   : > { %s1727_s21 = scalar_lea.hbm %s2532_s2, 512  ;;  %p1728_p3 = scmp.lt.u32.totalorder %s2129_s18, %s2532_s2 }
  0x63   : > { %p1725_p7 = pnand %p1723_p11, %p2082_p2  ;;  %p1729_p5 = scmp.lt.u32.totalorder %s1727_s21, %s1722_s11 }
  0x64   : > { %p1731_p8 = scmp.lt.u32.totalorder %s1722_s11, %s2129_s18 }
  0x65   : > { %p1726_p1 = pneg %p1725_p7  ;;  %p1730_p6 = por %p1729_p5, %p1728_p3 }
  0x67   : > { %p1732_p9 = por %p1731_p8, %p1730_p6 }
  0x69   : > { %p1733_p12 = pnand %p1732_p9, %p1726_p1 }
  0x6b   : > { %1736 = shalt.err (!%p1733_p12)
}
  0x6c   : > { %s1737_s1 = scalar_lea.vmem %s2160_s17, 256  ;;  %s1938_s23 = smov [#allocation7]  }
  0x6d   : > { %p1738_p4 = scmp.ne.s32.totalorder %s2160_s17, %s1737_s1  ;;  %s1742_s19 = sshll.u32 %s1938_s23, 4  ;;  %s1743_s19 = int_to_ptr.vmem [resolvable:$false] %s1742_s19 }
  0x6e   : > { %s1744_s0 = scalar_lea.vmem %s1743_s19, 512  ;;  %p1745_p11 = scmp.lt.s32.totalorder %s2160_s17, %s1743_s19 }
  0x6f   : > { %p1740_p10 = pnand %p1738_p4, %p2082_p2  ;;  %p1746_p7 = scmp.lt.s32.totalorder %s1744_s0, %s1737_s1 }
  0x71   : > { %p1741_p13 = pneg %p1740_p10  ;;  %p1747_p3 = por %p1746_p7, %p1745_p11 }
  0x73   : > { %p1748_p5 = pnand %p1747_p3, %p1741_p13 }
  0x75   : > { %1751 = shalt.err (!%p1748_p5)
}
  0x76   : > { %1521 = dma.hbm_to_vmem [thread:$0]  (!%p2062_p0), %s2129_s18, 256, %s2160_s17, %s2076_s7, %s2571_s12, %s2571_s12, %s2570_s26  }
  0x77   : > { %s1418_s4 = sshll.u32 %s1928_s25, 9  ;;  %s323_s28 = scalar_lea.vmem [#allocation8], %s1368_s20 }
  0x78   : > { %s2192_s11 = scalar_lea.hbm %s2533_s3, %s1418_s4  ;;  %s331_s16 = sshll.u32 %s323_s28, 4  ;;  %s2196_s16 = int_to_ptr.vmem [resolvable:$true] %s331_s16 }
  0x79   : > { %s320_s21 = scalar_lea.sflag [#allocation9], %s2058_s13  ;;  %s1752_s1 = scalar_lea.hbm %s2192_s11, 512 }
  0x7a   : > { %p1753_p1 = scmp.ne.s32.totalorder %s2192_s11, %s1752_s1  ;;  %s1757_s26 = scalar_lea.hbm %s2533_s3, 1024 }
  0x7b   : > { %p1758_p9 = scmp.lt.u32.totalorder %s2192_s11, %s2533_s3  ;;  %p1759_p12 = scmp.lt.u32.totalorder %s1757_s26, %s1752_s1 }
  0x7c   : > { %p1755_p6 = pnand %p1753_p1, %p2082_p2  ;;  %p1761_p10 = scmp.lt.u32.totalorder %s1752_s1, %s2192_s11 }
  0x7d   : > { %p1760_p4 = por %p1759_p12, %p1758_p9 }
  0x7e   : > { %p1756_p8 = pneg %p1755_p6 }
  0x7f   : > { %p1762_p13 = por %p1761_p10, %p1760_p4 }
  0x81   : > { %p1763_p11 = pnand %p1762_p13, %p1756_p8 }
  0x83   : > { %1766 = shalt.err (!%p1763_p11)
}
  0x84   : > { %s1767_s20 = scalar_lea.vmem %s2196_s16, 512  ;;  %s1939_s23 = smov [#allocation8]  }
  0x85   : > { %p1768_p7 = scmp.ne.s32.totalorder %s2196_s16, %s1767_s20  ;;  %s1772_s19 = sshll.u32 %s1939_s23, 4  ;;  %s1773_s19 = int_to_ptr.vmem [resolvable:$false] %s1772_s19 }
  0x86   : > { %s1774_s0 = scalar_lea.vmem %s1773_s19, 1024  ;;  %p1775_p1 = scmp.lt.s32.totalorder %s2196_s16, %s1773_s19 }
  0x87   : > { %p1770_p3 = pnand %p1768_p7, %p2082_p2  ;;  %p1776_p6 = scmp.lt.s32.totalorder %s1774_s0, %s1767_s20 }
  0x89   : > { %p1771_p5 = pneg %p1770_p3  ;;  %p1777_p9 = por %p1776_p6, %p1775_p1 }
  0x8b   : > { %p1778_p12 = pnand %p1777_p9, %p1771_p5 }
  0x8d   : > { %1781 = shalt.err (!%p1778_p12)
}
  0x8e   : > { %s1940_s4 = smov 128   ;;  %s1941_s15 = smov 8  }
  0x8f   : > { %1524 = dma.hbm_to_vmem [thread:$0]  (!%p2062_p0), %s2192_s11, 512, %s2196_s16, %s320_s21, %s1940_s4, %s1940_s4, %s1941_s15  }
  0x90   : > { %p2573_p2 = scmp.ne.s32.totalorder %s2568_s30, 0 }
  0x91   : > { %s2225_s29 = sand.u32 (!%p2573_p2), 1, %s1916_s22   ;;  %p2574_p8 = scmp.ne.s32.totalorder (!%p2573_p2), %s2560_s9, 0 }
  0x92   : > { %343 = sbr.rel (%p2573_p2) target bundleno = 941 (0x3ad), region = 36  ;;  %s2228_s8 = sshll.u32 (!%p2573_p2), %s2225_s29, 4 }
  0x93   : > { %s346_s28 = scalar_lea.sflag (!%p2573_p2), [#allocation3], %s2225_s29  ;;  %s2232_s1 = scalar_lea.vmem (!%p2573_p2), [#allocation2], %s2228_s8 }
  0x99   : > { %1891 = dma.done.wait (%p2574_p8), %s346_s28, 256  }
  0x9a   : > { %1893 = vsyncadd (%p2574_p8), %s346_s28, 4294967040  ;;  %s354_s13 = sand.u32 1, %s2018_s27   ;;  %s1373_s14 = sshll.u32 %s2225_s29, 6 }
  0x9b   : > { %s355_s30 = scalar_lea.sflag [#allocation6], %s354_s13  ;;  %s2242_s11 = scalar_lea.vmem [#allocation5], %s1373_s14 }
  0x9c   : > { %1895 = dma.done.wait (%p2574_p8), %s355_s30, 1280  }
  0x9d   : > { %1897 = vsyncadd (%p2574_p8), %s355_s30, 4294966016  ;;  %s1375_s16 = sshll.u32 %s2225_s29, 5  ;;  %s2250_s21 = scalar_lea.vmem [#allocation7], %s2228_s8 }
  0x9e   : > { %s373_s7 = scalar_lea.sflag [#allocation9], %s2225_s29  ;;  %s2255_s18 = scalar_lea.vmem [#allocation8], %s1375_s16 }
  0x9f   : > { %1899 = dma.done.wait (%p2574_p8), %s373_s7, 512  }
  0xa0   : > { %1901 = vsyncadd (%p2574_p8), %s373_s7, 4294966784  ;;  %v1942_v0 = vmov 0.0   ;;  %vm1943_vm0 = vmmov 0   ;;  %v1598_v1 = vld [vmem:[%s2242_s11] sm:$0xff]   ;;  %v1599_v2 = vld [vmem:[%s2242_s11 + $0x10] sm:$0xff]   ;;  %vm478_vm1 = vcmask 261120   ;;  %v692_v13 = vlaneseq }
  0xa1   : > { %1442 = vmatprep.subr.bf16.mxu0 %v1942_v0  ;;  %1450 = vmatprep.subr.bf16.mxu1 %v1942_v0  ;;  %v1600_v3 = vld [vmem:[%s2242_s11 + $0x8] sm:$0xff]   ;;  %v1601_v4 = vld [vmem:[%s2242_s11 + $0x18] sm:$0xff]   ;;  %v438_v5 = vld [vmem:[%s2232_s1] sm:$0xf]  ;;  %vm705_vm3 = vcmask 64512   ;;  %vm878_vm4 = vcmask 1043456  }
  0xa2   : > { %1446 = vmatprep.mubr.msk.bf16.mxu0 %vm1943_vm0, %v1942_v0  ;;  %1454 = vmatprep.mubr.msk.bf16.mxu1 %vm1943_vm0, %v1942_v0  ;;  %v1602_v6 = vld [vmem:[%s2242_s11 + $0x20] sm:$0xff]   ;;  %v1603_v8 = vld [vmem:[%s2242_s11 + $0x30] sm:$0xff]   ;;  %v1604_v9 = vld [vmem:[%s2242_s11 + $0x28] sm:$0xff]   ;;  %v2299_v14 = vshrl.u32 %v692_v13, 7  ;;  %v2301_v15 = vand.u32 127, %v692_v13  ;;  %vm1064_vm5 = vcmask 60416  }
  0xa3   : > { %1443 = vmatpush3.bf16.msra.mxu0 %v1598_v1  ;;  %1451 = vmatpush3.bf16.msra.mxu1 %v1599_v2  ;;  %v439_v7 = vld [vmem:[%s2232_s1 + $0x4] sm:$0xf]  ;;  %v1605_v10 = vld [vmem:[%s2242_s11 + $0x38] sm:$0xff]   ;;  %v463_v2 = vld [vmem:[%s2255_s18 + $0x8] sm:$0xff]  ;;  %s2356_s9 = scalar_lea.vmem [#allocation11], %s2228_s8  ;;  %s2380_s26 = scalar_lea.vmem [#allocation13], %s2228_s8 }
  0xa4   : > { %1444 = vmatprep.subr.bf16.mxu0 %v1942_v0  ;;  %1452 = vmatprep.subr.bf16.mxu1 %v1942_v0  ;;  %v440_v11 = vld [vmem:[%s2232_s1 + $0x8] sm:$0xf]  ;;  %v441_v12 = vld [vmem:[%s2232_s1 + $0xc] sm:$0xf]  ;;  %v802_v16 = vsub.s32 %v2299_v14, %v2301_v15  ;;  %vm698_vm2 = vcmp.gt.s32.totalorder %v2301_v15, %v2299_v14  ;;  %s1136_s12 = sshll.u32 %s2380_s26, 4  ;;  %s1420_s17 = sshll.u32 %s1924_s24, 8  ;;  %s2433_s12 = int_to_ptr.vmem [resolvable:$true] %s1136_s12 }
  0xa5   : > { %s1119_s20 = sshll.u32 %s2356_s9, 4  ;;  %s2398_s0 = scalar_lea.hbm %s2535_s5, %s1420_s17  ;;  %s2400_s20 = int_to_ptr.vmem [resolvable:$true] %s1119_s20 }
  0xa6   : > { %s2404_s4 = scalar_lea.sflag [#allocation12], %s354_s13  ;;  %s1782_s15 = scalar_lea.vmem %s2400_s20, 256 }
  0xa7   : > { %1445 = vmatpush3.bf16.msra.mxu0 %v1600_v3  ;;  %1453 = vmatpush3.bf16.msra.mxu1 %v1601_v4  ;;  %v1392_v3 = vmul.f32 -5.0, %v463_v2  ;;  %p1783_p0 = scmp.ne.s32.totalorder %s2400_s20, %s1782_s15  ;;  %p2575_p4 = scmp.ne.s32.totalorder %s2561_s10, 0 }
  0xa8   : > { %1458 = vmatprep.subr.bf16.mxu0 %v1942_v0  ;;  %1466 = vmatprep.subr.bf16.mxu1 %v1942_v0  ;;  %s1945_s8 = smov [#allocation11]  }
  0xa9   : > { %v760_v4 = vmul.f32 1.442695, %v1392_v3  ;;  %p1784_p10 = pnand %p1783_p0, %p2575_p4  ;;  %s1786_s28 = sshll.u32 %s1945_s8, 4  ;;  %s1787_s28 = int_to_ptr.vmem [resolvable:$false] %s1786_s28 }
  0xaa   : > { %1447 = vmatmul.mubr.msk.bf16.vlgmr.msra.gmra.mrb[0].mxu0 %vm478_vm1, %v438_v5  ;;  %1455 = vmatmul.mubr.msk.bf16.vlgmr.msra.gmra.mrb[0].mxu1 %vm478_vm1, %v439_v7  ;;  %v464_v5 = vld [vmem:[%s2255_s18 + $0x10] sm:$0xff]  ;;  %s1788_s1 = scalar_lea.vmem %s1787_s28, 512  ;;  %p1789_p11 = scmp.lt.s32.totalorder %s2400_s20, %s1787_s28 }
  0xab   : > { %1459 = vmatpush3.bf16.msra.mxu0 %v1602_v6  ;;  %1467 = vmatpush3.bf16.msra.mxu1 %v1603_v8  ;;  %v1393_v6 = vmul.f32 -5.0, %v464_v5  ;;  %v465_v8 = vld [vmem:[%s2255_s18 + $0x18] sm:$0xff]  ;;  %p1785_p13 = pneg %p1784_p10  ;;  %p1790_p7 = scmp.lt.s32.totalorder %s1788_s1, %s1782_s15 }
  0xac   : > { %1460 = vmatprep.subr.bf16.mxu0 %v1942_v0  ;;  %1468 = vmatprep.subr.bf16.mxu1 %v1942_v0 }
  0xad   : > { %1462 = vmatprep.mubr.msk.bf16.mxu0 %vm1943_vm0, %v1942_v0  ;;  %1470 = vmatprep.mubr.msk.bf16.mxu1 %vm1943_vm0, %v1942_v0  ;;  %v762_v7 = vmul.f32 1.442695, %v1393_v6  ;;  %p1791_p3 = por %p1790_p7, %p1789_p11 }
  0xaf   : > { %1461 = vmatpush3.bf16.msra.mxu0 %v1604_v9  ;;  %1469 = vmatpush3.bf16.msra.mxu1 %v1605_v10  ;;  %v1394_v9 = vmul.f32 -5.0, %v465_v8  ;;  %v462_v10 = vld [vmem:[%s2255_s18] sm:$0xff]  ;;  %p1792_p5 = pnand %p1791_p3, %p1785_p13 }
  0xb0   : > { %1474 = vmatprep.subr.bf16.mxu0 %v1942_v0  ;;  %1480 = vmatprep.subr.bf16.mxu1 %v1942_v0 }
  0xb1   : > { %v764_v13 = vmul.f32 1.442695, %v1394_v9 }
  0xb2   : > { %1463 = vmatmul.mubr.msk.bf16.vlgmr.msra.gmra.mrb[4].mxu0 %vm478_vm1, %v440_v11  ;;  %1471 = vmatmul.mubr.msk.bf16.vlgmr.msra.gmra.mrb[4].mxu1 %vm478_vm1, %v441_v12  ;;  %v1391_v11 = vmul.f32 -5.0, %v462_v10  ;;  %v458_v12 = vld [vmem:[%s2250_s21] sm:$0xf] }
  0xb3   : > { %1476 = vmatprep.mubr.msk.bf16.mxu0 %vm1943_vm0, %v1942_v0  ;;  %1482 = vmatprep.mubr.msk.bf16.mxu1 %vm1943_vm0, %v1942_v0 }
 0x17d   : > { %v516_v17 = vpop.f32.mrb[0].mxu0  ;;  %v571_v20 = vpop.f32.mrb[0].mxu1 }
 0x17e   : > { %v687_v18 = vmul.f32 0.17677669, %v516_v17  ;;  %v1448_v19 = vpop.f32.mrb[1].mxu0  ;;  %v688_v22 = vmul.f32 0.17677669, %v571_v20  ;;  %v1456_v23 = vpop.f32.mrb[1].mxu1 }
 0x17f   : > { %v519_v21 = vpop.f32.mrb[2].mxu0  ;;  %v574_v25 = vpop.f32.mrb[2].mxu1  ;;  %v880_v17 = vsel %vm878_vm4, %v458_v12, 0  ;;  %v459_v20 = vld [vmem:[%s2250_s21 + $0x4] sm:$0xf] }
 0x180   : > { %v1449_v24 = vpop.f32.mrb[3].mxu0  ;;  %v701_v26 = vsel %vm698_vm2, -inf, %v687_v18  ;;  %v1457_v27 = vpop.f32.mrb[3].mxu1  ;;  %v702_v29 = vsel %vm698_vm2, -inf, %v688_v22  ;;  %v758_v18 = vmul.f32 1.442695, %v1391_v11  ;;  %1475 = vmatpush3.bf16.msra.mxu0 %v880_v17 }
 0x181   : > { %v706_v28 = vsel %vm705_vm3, %v701_v26, -inf  ;;  %v709_v30 = vsel %vm705_vm3, %v702_v29, -inf  ;;  %1486 = vmatprep.subr.bf16.mxu0 %v1942_v0  ;;  %v926_v21 = vsel %vm878_vm4, %v459_v20, 0  ;;  %v460_v11 = vld [vmem:[%s2250_s21 + $0x8] sm:$0xf] }
 0x182   : > { %707 = vmax.xlane.f32.xlu0 %v706_v28  ;;  %1481 = vmatpush3.bf16.msra.mxu1 %v926_v21  ;;  %v461_v20 = vld [vmem:[%s2250_s21 + $0xc] sm:$0xf] }
 0x183   : > { %1492 = vmatprep.subr.bf16.mxu1 %v1942_v0 }
 0x185   : > { %v626_v31 = vpop.f32.mrb[4].mxu0  ;;  %v681_v34 = vpop.f32.mrb[4].mxu1 }
 0x186   : > { %v689_v32 = vmul.f32 0.17677669, %v626_v31  ;;  %710 = vmax.xlane.f32.xlu0 %v709_v30  ;;  %v1464_v33 = vpop.f32.mrb[5].mxu0  ;;  %v690_v36 = vmul.f32 0.17677669, %v681_v34  ;;  %v1472_v37 = vpop.f32.mrb[5].mxu1 }
 0x187   : > { %v629_v35 = vpop.f32.mrb[6].mxu0  ;;  %v684_v39 = vpop.f32.mrb[6].mxu1  ;;  %v1944_v30 = vmov 0  }
 0x188   : > { %v1465_v38 = vpop.f32.mrb[7].mxu0  ;;  %v703_v40 = vsel %vm698_vm2, -inf, %v689_v32  ;;  %v1473_v41 = vpop.f32.mrb[7].mxu1  ;;  %v704_v43 = vsel %vm698_vm2, -inf, %v690_v36  ;;  %1597 = vset.pattern.permute.xlu1 %v1944_v30  ;;  %1596 = vset.pattern.permute.xlu0 %v1944_v30 }
 0x189   : > { %v712_v42 = vsel %vm705_vm3, %v703_v40, -inf  ;;  %v715_v44 = vsel %vm705_vm3, %v704_v43, -inf }
 0x18a   : > { %713 = vmax.xlane.f32.xlu1 %v712_v42 }
 0x18e   : > { %716 = vmax.xlane.f32.xlu1 %v715_v44 }
 0x20f   : > { %v708_v45 = vpop.xlane.xlu0 %707 }
 0x210   : > { %v718_v46 = vsub.f32 %v701_v26, %v708_v45 }
 0x212   : > { %v722_v47 = vmul.f32 1.442695, %v718_v46 }
 0x213   : > { %v711_v48 = vpop.xlane.xlu0 %710 }
 0x214   : > { %1606 = vpow2.f32 %v722_v47  ;;  %v719_v49 = vsub.f32 %v702_v29, %v711_v48 }
 0x216   : > { %v724_v50 = vmul.f32 1.442695, %v719_v49 }
 0x217   : > { %v714_v51 = vpop.xlane.xlu1 %713 }
 0x218   : > { %1608 = vpow2.f32 %v724_v50  ;;  %v720_v52 = vsub.f32 %v703_v40, %v714_v51 }
 0x21a   : > { %v726_v53 = vmul.f32 1.442695, %v720_v52 }
 0x21b   : > { %v717_v54 = vpop.xlane.xlu1 %716 }
 0x21c   : > { %1610 = vpow2.f32 %v726_v53  ;;  %v721_v55 = vsub.f32 %v704_v43, %v717_v54 }
 0x21e   : > { %v2323_v56 = vpop.eup %1606  ;;  %v728_v57 = vmul.f32 1.442695, %v721_v55 }
 0x21f   : > { %v730_v58 = vsel %vm705_vm3, %v2323_v56, 0.0 }
 0x220   : > { %1612 = vpow2.f32 %v728_v57  ;;  %731 = vadd.xlane.f32.xlu0 %v730_v58 }
 0x221   : > { %1614 = vpow2.f32 %v760_v4 }
 0x222   : > { %v2327_v59 = vpop.eup %1608  ;;  %1616 = vpow2.f32 %v762_v7 }
 0x223   : > { %v733_v60 = vsel %vm705_vm3, %v2327_v59, 0.0  ;;  %1618 = vpow2.f32 %v764_v13 }
 0x224   : > { %734 = vadd.xlane.f32.xlu1 %v733_v60  ;;  %1620 = vpow2.f32 %v758_v18  ;;  %v972_v18 = vsel %vm878_vm4, %v460_v11, 0 }
 0x226   : > { %v2331_v61 = vpop.eup %1610 }
 0x227   : > { %v736_v62 = vsel %vm705_vm3, %v2331_v61, 0.0 }
 0x228   : > { %737 = vadd.xlane.f32.xlu0 %v736_v62 }
 0x22a   : > { %v2335_v63 = vpop.eup %1612 }
 0x22b   : > { %v739_v1 = vsel %vm705_vm3, %v2335_v63, 0.0  ;;  %v1615_v19 = vpop.eup %1614 }
 0x22c   : > { %740 = vadd.xlane.f32.xlu1 %v739_v1  ;;  %v767_v22 = vadd.f32 1.0, %v1615_v19  ;;  %v1617_v23 = vpop.eup %1616 }
 0x22d   : > { %v768_v24 = vadd.f32 1.0, %v1617_v23  ;;  %v1619_v25 = vpop.eup %1618 }
 0x22e   : > { %1622 = vrcp.f32 %v767_v22  ;;  %v1621_v26 = vpop.eup %1620  ;;  %v769_v27 = vadd.f32 1.0, %v1619_v25  ;;  %v1018_v22 = vsel %vm878_vm4, %v461_v20, 0 }
 0x22f   : > { %1624 = vrcp.f32 %v768_v24  ;;  %v766_v28 = vadd.f32 1.0, %v1621_v26 }
 0x230   : > { %1626 = vrcp.f32 %v769_v27 }
 0x231   : > { %1628 = vrcp.f32 %v766_v28 }
 0x238   : > { %v1623_v29 = vpop.eup %1622 }
 0x239   : > { %v779_v31 = vadd.f32 1e-05, %v1623_v29  ;;  %v1625_v33 = vpop.eup %1624 }
 0x23a   : > { %v780_v35 = vadd.f32 1e-05, %v1625_v33  ;;  %v1627_v37 = vpop.eup %1626 }
 0x23b   : > { %v783_v32 = vmul.f32 1.0986123, %v779_v31  ;;  %v1629_v38 = vpop.eup %1628  ;;  %v781_v40 = vadd.f32 1e-05, %v1627_v37 }
 0x23c   : > { %v784_v36 = vmul.f32 1.0986123, %v780_v35  ;;  %v778_v41 = vadd.f32 1e-05, %v1629_v38 }
 0x23d   : > { %v788_v34 = vmul.f32 1.442695, %v783_v32  ;;  %v785_v42 = vmul.f32 1.0986123, %v781_v40 }
 0x23e   : > { %v790_v39 = vmul.f32 1.442695, %v784_v36  ;;  %v782_v43 = vmul.f32 1.0986123, %v778_v41 }
 0x23f   : > { %1630 = vpow2.f32 %v788_v34  ;;  %v792_v44 = vmul.f32 1.442695, %v785_v42 }
 0x240   : > { %1632 = vpow2.f32 %v790_v39  ;;  %v786_v45 = vmul.f32 1.442695, %v782_v43 }
 0x241   : > { %1634 = vpow2.f32 %v792_v44 }
 0x242   : > { %1636 = vpow2.f32 %v786_v45 }
 0x249   : > { %v1631_v46 = vpop.eup %1630 }
 0x24a   : > { %v1396_v47 = vadd.f32 -1.0, %v1631_v46  ;;  %v1633_v48 = vpop.eup %1632 }
 0x24b   : > { %v1397_v49 = vadd.f32 -1.0, %v1633_v48  ;;  %v1635_v50 = vpop.eup %1634 }
 0x24c   : > { %1638 = vrcp.f32 %v1396_v47  ;;  %v1637_v51 = vpop.eup %1636  ;;  %v1398_v52 = vadd.f32 -1.0, %v1635_v50 }
 0x24d   : > { %1640 = vrcp.f32 %v1397_v49  ;;  %v1395_v53 = vadd.f32 -1.0, %v1637_v51 }
 0x24e   : > { %1642 = vrcp.f32 %v1398_v52 }
 0x24f   : > { %1644 = vrcp.f32 %v1395_v53 }
 0x256   : > { %v1639_v54 = vpop.eup %1638 }
 0x257   : > { %v812_v55 = vmul.f32 %v1639_v54, %v1639_v54  ;;  %v1641_v57 = vpop.eup %1640  ;;  %v807_v4 = vmul.f32 0.3989423, %v1639_v54 }
 0x258   : > { %v813_v58 = vmul.f32 %v1641_v57, %v1641_v57  ;;  %v1643_v60 = vpop.eup %1642  ;;  %v808_v5 = vmul.f32 0.3989423, %v1641_v57 }
 0x259   : > { %822 = vperm.xlu1 %1597, %v812_v55   ;;  %v1645_v62 = vpop.eup %1644  ;;  %v814_v1 = vmul.f32 %v1643_v60, %v1643_v60  ;;  %v809_v6 = vmul.f32 0.3989423, %v1643_v60 }
 0x25a   : > { %v811_v2 = vmul.f32 %v1645_v62, %v1645_v62  ;;  %v806_v3 = vmul.f32 0.3989423, %v1645_v62 }
 0x25c   : > { %817 = vperm.xlu0 %1596, %v811_v2  }
 0x25d   : > { %827 = vperm.xlu1 %1597, %v813_v58  }
 0x261   : > { %832 = vperm.xlu1 %1597, %v814_v1  }
 0x265   : > { %849 = vperm.xlu1 %1597, %v806_v3  }
 0x269   : > { %854 = vperm.xlu1 %1597, %v807_v4  }
 0x26d   : > { %859 = vperm.xlu1 %1597, %v808_v5  }
 0x271   : > { %864 = vperm.xlu1 %1597, %v809_v6  }
 0x2ad   : > { %v732_v7 = vpop.xlane.xlu0 %731 }
 0x2ae   : > { %1646 = vrcp.f32 %v732_v7 }
 0x2b1   : > { %v735_v8 = vpop.xlane.xlu1 %734 }
 0x2b2   : > { %1648 = vrcp.f32 %v735_v8 }
 0x2b5   : > { %v738_v9 = vpop.xlane.xlu0 %737 }
 0x2b6   : > { %1650 = vrcp.f32 %v738_v9 }
 0x2b8   : > { %v1647_v10 = vpop.eup %1646 }
 0x2b9   : > { %v746_v12 = vmul.f32 %v1647_v10, %v2323_v56  ;;  %v741_v13 = vpop.xlane.xlu1 %740 }
 0x2ba   : > { %1652 = vrcp.f32 %v741_v13 }
 0x2bb   : > { %v871_v17 = vpack.c.bf16 %v746_v12, %v746_v12 }
 0x2bc   : > { %v1649_v19 = vpop.eup %1648 }
 0x2bd   : > { %v747_v21 = vmul.f32 %v1649_v19, %v2327_v59  ;;  %1477 = vmatmul.mubr.msk.bf16.vlgmr.msra.gmra.mrb[8].mxu0 %vm705_vm3, %v871_v17  ;;  %1065 = vst.msk [vmem:[%s2356_s9] sm:$0xf] %vm1064_vm5, %v871_v17 }
 0x2be   : > { %1487 = vmatpush3.bf16.msra.mxu0 %v972_v18  ;;  %1488 = vmatprep.mubr.msk.bf16.mxu0 %vm1943_vm0, %v1942_v0 }
 0x2bf   : > { %v872_v56 = vpack.c.bf16 %v747_v21, %v747_v21 }
 0x2c0   : > { %v1651_v23 = vpop.eup %1650 }
 0x2c1   : > { %v748_v59 = vmul.f32 %v1651_v23, %v2331_v61  ;;  %1483 = vmatmul.mubr.msk.bf16.vlgmr.msra.gmra.mrb[8].mxu1 %vm705_vm3, %v872_v56  ;;  %1066 = vst.msk [vmem:[%s2356_s9 + $0x4] sm:$0xf] %vm1064_vm5, %v872_v56  ;;  %v803_v61 = vcvt.s32.f32 %v802_v16 }
 0x2c2   : > { %1493 = vmatpush3.bf16.msra.mxu1 %v1018_v22  ;;  %1494 = vmatprep.mubr.msk.bf16.mxu1 %vm1943_vm0, %v1942_v0 }
 0x2c3   : > { %v873_v24 = vpack.c.bf16 %v748_v59, %v748_v59  ;;  %v804_v28 = vmul.f32 0.5, %v803_v61 }
 0x2c4   : > { %v1653_v25 = vpop.eup %1652 }
 0x2c5   : > { %v749_v26 = vmul.f32 %v1653_v25, %v2335_v63  ;;  %1489 = vmatmul.mubr.msk.bf16.vlgmr.msra.gmra.mrb[12].mxu0 %vm705_vm3, %v873_v24  ;;  %1067 = vst.msk [vmem:[%s2356_s9 + $0x8] sm:$0xf] %vm1064_vm5, %v873_v24  ;;  %v805_v29 = vmul.f32 %v804_v28, %v803_v61 }
 0x2c7   : > { %v874_v27 = vpack.c.bf16 %v749_v26, %v749_v26  ;;  %v810_v0 = vsub.f32 0.0, %v805_v29 }
 0x2c9   : > { %1495 = vmatmul.mubr.msk.bf16.vlgmr.msra.gmra.mrb[12].mxu1 %vm705_vm3, %v874_v27  ;;  %1068 = vst.msk [vmem:[%s2356_s9 + $0xc] sm:$0xf] %vm1064_vm5, %v874_v27 }
 0x2d8   : > { %v823_v30 = vpop.permute.xlu1 %822 }
 0x2d9   : > { %v836_v31 = vmul.f32 %v823_v30, %v810_v0 }
 0x2db   : > { %v841_v32 = vmul.f32 1.442695, %v836_v31  ;;  %v818_v37 = vpop.permute.xlu0 %817 }
 0x2dc   : > { %v828_v63 = vpop.permute.xlu1 %827  ;;  %v835_v38 = vmul.f32 %v818_v37, %v810_v0 }
 0x2dd   : > { %1654 = vpow2.f32 %v841_v32  ;;  %v837_v33 = vmul.f32 %v828_v63, %v810_v0 }
 0x2de   : > { %v839_v40 = vmul.f32 1.442695, %v835_v38 }
 0x2df   : > { %v843_v34 = vmul.f32 1.442695, %v837_v33 }
 0x2e0   : > { %v833_v35 = vpop.permute.xlu1 %832 }
 0x2e1   : > { %1656 = vpow2.f32 %v843_v34  ;;  %v838_v36 = vmul.f32 %v833_v35, %v810_v0 }
 0x2e3   : > { %v845_v39 = vmul.f32 1.442695, %v838_v36 }
 0x2e4   : > { %v850_v14 = vpop.permute.xlu1 %849 }
 0x2e5   : > { %1658 = vpow2.f32 %v845_v39 }
 0x2e6   : > { %1660 = vpow2.f32 %v839_v40 }
 0x2e7   : > { %v1655_v15 = vpop.eup %1654 }
 0x2e8   : > { %v855_v16 = vpop.permute.xlu1 %854 }
 0x2e9   : > { %v868_v41 = vmul.f32 %v1655_v15, %v855_v16 }
 0x2eb   : > { %v1657_v42 = vpop.eup %1656  ;;  %v1070_v43 = vpack.c.bf16 %v868_v41, %v868_v41 }
 0x2ec   : > { %v860_v44 = vpop.permute.xlu1 %859 }
 0x2ed   : > { %1074 = vst.msk [vmem:[%s2380_s26 + $0x4] sm:$0xf] %vm1064_vm5, %v1070_v43  ;;  %v869_v45 = vmul.f32 %v1657_v42, %v860_v44 }
 0x2ef   : > { %v1659_v46 = vpop.eup %1658  ;;  %v1071_v47 = vpack.c.bf16 %v869_v45, %v869_v45 }
 0x2f0   : > { %v1661_v48 = vpop.eup %1660  ;;  %v865_v49 = vpop.permute.xlu1 %864 }
 0x2f1   : > { %v867_v50 = vmul.f32 %v1661_v48, %v850_v14  ;;  %1075 = vst.msk [vmem:[%s2380_s26 + $0x8] sm:$0xf] %vm1064_vm5, %v1071_v47  ;;  %v870_v51 = vmul.f32 %v1659_v46, %v865_v49 }
 0x2f3   : > { %v1069_v52 = vpack.c.bf16 %v867_v50, %v867_v50  ;;  %v1072_v53 = vpack.c.bf16 %v870_v51, %v870_v51 }
 0x2f5   : > { %1073 = vst.msk [vmem:[%s2380_s26] sm:$0xf] %vm1064_vm5, %v1069_v52  ;;  %1076 = vst.msk [vmem:[%s2380_s26 + $0xc] sm:$0xf] %vm1064_vm5, %v1072_v53 }
 0x2f6   : > { %1795 = shalt.err (!%p1792_p5)
}
 0x2f7   : > { %s1796_s27 = scalar_lea.hbm %s2398_s0, 256  ;;  %s1800_s30 = scalar_lea.hbm %s2535_s5, 512 }
 0x2f8   : > { %p1797_p1 = scmp.ne.s32.totalorder %s2398_s0, %s1796_s27  ;;  %p1801_p12 = scmp.lt.u32.totalorder %s2398_s0, %s2535_s5 }
 0x2f9   : > { %p1802_p2 = scmp.lt.u32.totalorder %s1800_s30, %s1796_s27  ;;  %p1804_p0 = scmp.lt.u32.totalorder %s1796_s27, %s2398_s0 }
 0x2fa   : > { %p1798_p6 = pnand %p1797_p1, %p2575_p4 }
 0x2fb   : > { %p1803_p8 = por %p1802_p2, %p1801_p12 }
 0x2fc   : > { %p1799_p9 = pneg %p1798_p6 }
 0x2fd   : > { %p1805_p10 = por %p1804_p0, %p1803_p8 }
 0x2ff   : > { %p1806_p13 = pnand %p1805_p10, %p1799_p9 }
 0x301   : > { %1809 = shalt.err (!%p1806_p13)
}
 0x302   : > { %s1946_s7 = smov 64   ;;  %s1947_s18 = smov 4  }
 0x303   : > { %1507 = dma.vmem_to_hbm [thread:$0]  (%p2575_p4), %s2400_s20, 256, %s2398_s0, %s2404_s4, %s1946_s7, %s1946_s7, %s1947_s18  }
 0x304   : > { %s2440_s19 = scalar_lea.hbm %s2536_s6, %s1420_s17  ;;  %s1810_s15 = scalar_lea.vmem %s2433_s12, 256 }
 0x305   : > { %p1811_p11 = scmp.ne.s32.totalorder %s2433_s12, %s1810_s15  ;;  %s1948_s8 = smov [#allocation13]  }
 0x306   : > { %s1814_s28 = sshll.u32 %s1948_s8, 4  ;;  %s1815_s28 = int_to_ptr.vmem [resolvable:$false] %s1814_s28 }
 0x307   : > { %p1812_p7 = pnand %p1811_p11, %p2575_p4  ;;  %s1816_s26 = scalar_lea.vmem %s1815_s28, 512 }
 0x308   : > { %p1817_p5 = scmp.lt.s32.totalorder %s2433_s12, %s1815_s28  ;;  %p1818_p1 = scmp.lt.s32.totalorder %s1816_s26, %s1810_s15 }
 0x309   : > { %p1813_p3 = pneg %p1812_p7 }
 0x30a   : > { %p1819_p6 = por %p1818_p1, %p1817_p5 }
 0x30c   : > { %p1820_p9 = pnand %p1819_p6, %p1813_p3 }
 0x30e   : > { %1823 = shalt.err (!%p1820_p9)
}
 0x30f   : > { %s1824_s17 = scalar_lea.hbm %s2440_s19, 256  ;;  %s1828_s1 = scalar_lea.hbm %s2536_s6, 512 }
 0x310   : > { %p1825_p12 = scmp.ne.s32.totalorder %s2440_s19, %s1824_s17  ;;  %p1829_p0 = scmp.lt.u32.totalorder %s2440_s19, %s2536_s6 }
 0x311   : > { %p1830_p10 = scmp.lt.u32.totalorder %s1828_s1, %s1824_s17  ;;  %p1832_p11 = scmp.lt.u32.totalorder %s1824_s17, %s2440_s19 }
 0x312   : > { %p1826_p2 = pnand %p1825_p12, %p2575_p4 }
 0x313   : > { %p1831_p13 = por %p1830_p10, %p1829_p0 }
 0x314   : > { %p1827_p8 = pneg %p1826_p2 }
 0x315   : > { %p1833_p7 = por %p1832_p11, %p1831_p13 }
 0x317   : > { %p1834_p3 = pnand %p1833_p7, %p1827_p8 }
 0x319   : > { %1837 = shalt.err (!%p1834_p3)
}
 0x31a   : > { %1508 = dma.vmem_to_hbm [thread:$0]  (%p2575_p4), %s2433_s12, 256, %s2440_s19, %s2404_s4, %s1946_s7, %s1946_s7, %s1947_s18  }
 0x31b   : > { %s415_s14 = scalar_lea.vmem [#allocation10], %s1375_s16  ;;  %s1419_s11 = sshll.u32 %s1924_s24, 9 }
 0x31c   : > { %s1102_s30 = sshll.u32 %s415_s14, 4  ;;  %s2576_s4 = sld [smem:[#allocation27_spill]]  ;;  %s2472_s30 = int_to_ptr.vmem [resolvable:$true] %s1102_s30 }
 0x31d   : > { %s1078_s24 = scalar_lea.sflag [#allocation4], %s2225_s29  ;;  %s1838_s7 = scalar_lea.vmem %s2472_s30, 512 }
 0x31e   : > { %p1839_p5 = scmp.ne.s32.totalorder %s2472_s30, %s1838_s7  ;;  %s1949_s18 = smov [#allocation10]  }
 0x31f   : > { %s1842_s9 = sshll.u32 %s1949_s18, 4  ;;  %s1843_s9 = int_to_ptr.vmem [resolvable:$false] %s1842_s9 }
 0x320   : > { %p1840_p1 = pnand %p1839_p5, %p2575_p4  ;;  %s1844_s23 = scalar_lea.vmem %s1843_s9, 1024 }
 0x321   : > { %p1845_p9 = scmp.lt.s32.totalorder %s2472_s30, %s1843_s9  ;;  %p1846_p12 = scmp.lt.s32.totalorder %s1844_s23, %s1838_s7 }
 0x322   : > { %s2478_s21 = scalar_lea.hbm %s2576_s4, %s1419_s11  ;;  %p1841_p6 = pneg %p1840_p1 }
 0x323   : > { %p1847_p2 = por %p1846_p12, %p1845_p9 }
 0x325   : > { %p1848_p8 = pnand %p1847_p2, %p1841_p6 }
 0x390   : > { %v916_v54 = vpop.f32.mrb[8].mxu0 }
 0x391   : > { %1060 = vst.msk [vmem:[%s415_s14] sm:$0xff] %vm478_vm1, %v916_v54  ;;  %v1478_v55 = vpop.f32.mrb[9].mxu0 }
 0x392   : > { %v919_v57 = vpop.f32.mrb[10].mxu0 }
 0x393   : > { %v1479_v58 = vpop.f32.mrb[11].mxu0 }
 0x394   : > { %v962_v60 = vpop.f32.mrb[8].mxu1 }
 0x395   : > { %1061 = vst.msk [vmem:[%s415_s14 + $0x8] sm:$0xff] %vm478_vm1, %v962_v60  ;;  %v1484_v62 = vpop.f32.mrb[9].mxu1 }
 0x396   : > { %v965_v1 = vpop.f32.mrb[10].mxu1 }
 0x397   : > { %v1485_v2 = vpop.f32.mrb[11].mxu1 }
 0x398   : > { %v1008_v3 = vpop.f32.mrb[12].mxu0 }
 0x399   : > { %1062 = vst.msk [vmem:[%s415_s14 + $0x10] sm:$0xff] %vm478_vm1, %v1008_v3  ;;  %v1490_v4 = vpop.f32.mrb[13].mxu0 }
 0x39a   : > { %v1011_v5 = vpop.f32.mrb[14].mxu0 }
 0x39b   : > { %v1491_v6 = vpop.f32.mrb[15].mxu0 }
 0x39c   : > { %v1054_v7 = vpop.f32.mrb[12].mxu1 }
 0x39d   : > { %1063 = vst.msk [vmem:[%s415_s14 + $0x18] sm:$0xff] %vm478_vm1, %v1054_v7  ;;  %v1496_v8 = vpop.f32.mrb[13].mxu1 }
 0x39e   : > { %v1057_v9 = vpop.f32.mrb[14].mxu1 }
 0x39f   : > { %1851 = shalt.err (!%p1848_p8)
}
 0x3a0   : > { %s1852_s19 = scalar_lea.hbm %s2478_s21, 512  ;;  %s1856_s28 = scalar_lea.hbm %s2576_s4, 1024 }
 0x3a1   : > { %p1853_p0 = scmp.ne.s32.totalorder %s2478_s21, %s1852_s19  ;;  %p1857_p11 = scmp.lt.u32.totalorder %s2478_s21, %s2576_s4 }
 0x3a2   : > { %p1858_p7 = scmp.lt.u32.totalorder %s1856_s28, %s1852_s19  ;;  %p1860_p5 = scmp.lt.u32.totalorder %s1852_s19, %s2478_s21 }
 0x3a3   : > { %p1854_p10 = pnand %p1853_p0, %p2575_p4 }
 0x3a4   : > { %p1859_p3 = por %p1858_p7, %p1857_p11 }
 0x3a5   : > { %p1855_p13 = pneg %p1854_p10 }
 0x3a6   : > { %p1861_p1 = por %p1860_p5, %p1859_p3 }
 0x3a8   : > { %p1862_p6 = pnand %p1861_p1, %p1855_p13 }
 0x3aa   : > { %1865 = shalt.err (!%p1862_p6)
}
 0x3ab   : > { %s1950_s20 = smov 128   ;;  %s1951_s0 = smov 8   ;;  %v1497_v10 = vpop.f32.mrb[15].mxu1 }
 0x3ac   : > { %1506 = dma.vmem_to_hbm [thread:$0]  (%p2575_p4), %s2472_s30, 512, %s2478_s21, %s1078_s24, %s1950_s20, %s1950_s20, %s1951_s0  }
 0x3ad PF: > { %s2577_s1 = sld [smem:[#allocation19_spill]]  ;;  %s2578_s27 = sld [smem:[#allocation24_spill]] }
 0x3ae   : > { %s2579_s13 = sld [smem:[#allocation21_spill]] }
 0x3b3   : > { %s1151_s14 = sand.u32 1, %s2577_s1   ;;  %p2580_p9 = scmp.ne.s32.totalorder %s2578_s27, 0 }
 0x3b4   : > { %p2581_p12 = scmp.ge.s32.totalorder %s2579_s13, 2  ;;  %s1152_s11 = scalar_lea.sflag [#allocation4], %s1151_s14 }
 0x3b6   : > { %p1526_p2 = pnand %p2581_p12, %p2580_p9 }
 0x3b8   : > { %1903 = dma.done.wait (!%p1526_p2), %s1152_s11, 512  }
 0x3b9   : > { %1905 = vsyncadd (!%p1526_p2), %s1152_s11, 4294966784  ;;  %s2582_s16 = sadd.s32 4294967294, %s2579_s13  }
 0x3ba   : > { %s1160_s12 = sand.u32 1, %s2582_s16  }
 0x3bb   : > { %s1161_s7 = scalar_lea.sflag [#allocation12], %s1160_s12 }
 0x3bc   : > { %1907 = dma.done.wait (!%p1526_p2), %s1161_s7, 512  }
 0x3bd   : > { %1909 = vsyncadd (!%p1526_p2), %s1161_s7, 4294966784  ;;  %s32_s26 = sadd.s32 1, %s2579_s13   ;;  %s2583_s10 = sld [smem:[#allocation20_spill]] }
 0x3be   : > { %p29_p4 = scmp.ge.s32.totalorder %s32_s26, 4   ;;  %s2584_s23 = sld [smem:[#allocation23_spill]] }
 0x3bf   : > { %s2585_s29 = sld [smem:[#allocation22_spill]]  ;;  %s2586_s21 = smov %s1916_s22 }
 0x3c0   : > { %s2588_s24 = smov %s1928_s25  ;;  %31 = sbr.rel (!%p29_p4) target bundleno = 16 (0x10), region = 150 }
 0x3c3   : > { %s2587_s22 = smov %s2583_s10 }
 0x3c5   : > { %s2589_s25 = smov %s2585_s29 }
 0x3c7   :  { %1175 = vsyncpa [#allocation3], 1 }
 0x3c8   :  { %1177 = vsyncpa [#allocation3 + $0x1], 1 }
 0x3c9   :  { %1178 = vsyncpa [#allocation6], 1 }
 0x3ca   :  { %1180 = vsyncpa [#allocation6 + $0x1], 1 }
 0x3cb   :  { %1181 = vsyncpa [#allocation9], 1 }
 0x3cc   :  { %1183 = vsyncpa [#allocation9 + $0x1], 1 }
 0x3cd   :  { %1184 = vsyncpa [#allocation4], 1 }
 0x3ce   :  { %1186 = vsyncpa [#allocation4 + $0x1], 1 }
 0x3cf   :  { %1187 = vsyncpa [#allocation12], 1 }
 0x3d0   :  { %1189 = vsyncpa [#allocation12 + $0x1], 1 }

</bundles_post_ra>
